<compile_context>
chip_gen: v7x
topology: tpu7x:2x2x1
jax: 0.10.0
libtpu: 0.0.40
codegen_flags: <defaults>
</compile_context>

<pallas_src>
import functools

import jax
import jax.numpy as jnp
from jax.experimental import pallas as pl
from jax.experimental.pallas import tpu as pltpu


def _round_up(x, m):
    return ((x + m - 1) // m) * m


def _quant_weight_kernel(ws_ref, w_ref, o_ref, *, weight_bits):
    # one-shot fake-quantization of the (padded) weight matrix
    wmax = jnp.float32(2.0 ** weight_bits - 1.0)
    w_den = ws_ref[0] * wmax
    inv_w = 1.0 / w_den                      # scalar reciprocal (computed once)
    o_ref[...] = jnp.clip(jnp.round(w_ref[...] * w_den), 0.0, wmax) * inv_w


def _qat_conv_kernel(as_ref, patch_ref, wq_ref, b_ref, o_ref, *, act_bits, mxu_dtype):
    k = pl.program_id(2)                     # reduction (Kdim) axis, last in grid

    amax = jnp.float32(2.0 ** act_bits - 1.0)
    a_den = as_ref[0] * amax                 # SMEM scalar
    inv_a = 1.0 / a_den                      # scalar reciprocal, then vmul only

    # fake-quantize activations (VPU), fused with the matmul
    x = patch_ref[...]
    xq = jnp.clip(jnp.round(x * a_den), 0.0, amax) * inv_a

    # init the resident f32 output block with the bias on the first reduction step
    @pl.when(k == 0)
    def _():
        o_ref[...] = jnp.broadcast_to(b_ref[...], o_ref.shape)

    # accumulate directly into the resident output block (f32 MXU accumulate)
    o_ref[...] += jnp.dot(xq.astype(mxu_dtype), wq_ref[...].astype(mxu_dtype),
                          preferred_element_type=jnp.float32)


def qat_pcilt_conv2d(x, weight, bias, weight_scale, activation_scale, *,
                     stride=1, padding=0, activation_bits=8, weight_bits=8,
                     mxu_dtype=jnp.float32):
    """x: (N, Cin, H, W) f32; weight: (Cout, Cin, K, K); bias: (Cout,).
    Returns (N, Cout, Ho, Wo) f32, matching the PyTorch module's training forward.
    Set mxu_dtype=jnp.bfloat16 for full-rate MXU on v6e/v7x (slightly looser numerics)."""
    N, Cin, H, W = x.shape
    Cout, _, K, _ = weight.shape
    Ho = (H + 2 * padding - K) // stride + 1
    Wo = (W + 2 * padding - K) // stride + 1

    # --- layout glue: NCHW -> NHWC, spatial pad, im2col patch extraction ---
    # TODO(synk): fuse patch extraction into the kernel (BlockSpec over padded NHWC
    # rows) to remove the K^2 im2col HBM read amplification on mem-bound chips.
    x_nhwc = jnp.transpose(x, (0, 2, 3, 1))
    x_pad = jnp.pad(x_nhwc, ((0, 0), (padding, padding), (padding, padding), (0, 0)))
    patches = jnp.stack(
        [jnp.stack(
            [x_pad[:, kh:kh + stride * Ho:stride, kw:kw + stride * Wo:stride, :]
             for kw in range(K)], axis=3)
         for kh in range(K)], axis=3)                   # (N, Ho, Wo, K, K, Cin)
    Kdim = K * K * Cin
    M = N * Ho * Wo
    patches = patches.reshape(M, Kdim).astype(jnp.float32)

    # 128-aligned (lane-dense) contraction and output-channel sizes
    Kp = _round_up(Kdim, 128)
    Cp = _round_up(Cout, 128)

    # row tile: as large as possible, but keep >= 2 grid steps (2 TensorCores on v7x)
    Mp = _round_up(M, 128)
    tm = 512
    while tm > 128 and (Mp % tm != 0 or Mp // tm < 2):
        tm //= 2

    def _pick_tile(total):
        for cand in (512, 256):
            if cand <= total and total % cand == 0:
                return cand
        return 128

    tk = _pick_tile(Kp)
    tn = _pick_tile(Cp)

    # zero-pad: rows of patches (M), contraction columns (Kdim), output channels (Cout)
    patches = jnp.pad(patches, ((0, Mp - M), (0, Kp - Kdim)))
    w_mat = jnp.transpose(weight, (2, 3, 1, 0)).reshape(Kdim, Cout).astype(jnp.float32)
    w_mat = jnp.pad(w_mat, ((0, Kp - Kdim), (0, Cp - Cout)))
    b_mat = jnp.pad(bias.reshape(1, Cout).astype(jnp.float32), ((0, 0), (0, Cp - Cout)))

    ws = weight_scale.astype(jnp.float32)
    asc = activation_scale.astype(jnp.float32)

    # --- fake-quantize weights once (instead of once per main-grid step) ---
    wq_mat = pl.pallas_call(
        functools.partial(_quant_weight_kernel, weight_bits=weight_bits),
        out_shape=jax.ShapeDtypeStruct((Kp, Cp), jnp.float32),
        grid_spec=pltpu.PrefetchScalarGridSpec(
            num_scalar_prefetch=0,
            grid=(Cp // tn,),
            in_specs=[
                pl.BlockSpec(memory_space=pltpu.MemorySpace.SMEM),   # weight_scale
                pl.BlockSpec((Kp, tn), lambda j: (0, j)),            # weight matrix
            ],
            out_specs=pl.BlockSpec((Kp, tn), lambda j: (0, j)),
        ),
        compiler_params=pltpu.CompilerParams(dimension_semantics=("parallel",)),
    )(ws, w_mat)

    # --- main kernel: fused activation fake-quant + MXU matmul + bias ---
    kernel = functools.partial(_qat_conv_kernel, act_bits=activation_bits,
                               mxu_dtype=mxu_dtype)

    out = pl.pallas_call(
        kernel,
        out_shape=jax.ShapeDtypeStruct((Mp, Cp), jnp.float32),
        grid_spec=pltpu.PrefetchScalarGridSpec(
            num_scalar_prefetch=0,
            grid=(Mp // tm, Cp // tn, Kp // tk),
            in_specs=[
                pl.BlockSpec(memory_space=pltpu.MemorySpace.SMEM),   # activation_scale
                pl.BlockSpec((tm, tk), lambda i, j, k: (i, k)),      # im2col patches
                pl.BlockSpec((tk, tn), lambda i, j, k: (k, j)),      # pre-quantized weights
                pl.BlockSpec((1, tn), lambda i, j, k: (0, j)),       # bias
            ],
            out_specs=pl.BlockSpec((tm, tn), lambda i, j, k: (i, j)),
        ),
        compiler_params=pltpu.CompilerParams(
            dimension_semantics=("parallel", "parallel", "arbitrary"),
            vmem_limit_bytes=48 * 1024 * 1024),
    )(asc, patches, wq_mat, b_mat)

    out = out[:M, :Cout].reshape(N, Ho, Wo, Cout)
    return jnp.transpose(out, (0, 3, 1, 2))  # back to NCHW


def _reference(x, weight, bias, weight_scale, activation_scale, *,
               stride, padding, activation_bits, weight_bits):
    amax = 2.0 ** activation_bits - 1.0
    wmax = 2.0 ** weight_bits - 1.0
    ws = weight_scale[0]
    asc = activation_scale[0]
    xq = jnp.clip(jnp.round(x * asc * amax), 0.0, amax) / (asc * amax)
    wq = jnp.clip(jnp.round(weight * ws * wmax), 0.0, wmax) / (ws * wmax)
    out = jax.lax.conv_general_dilated(
        xq, wq, window_strides=(stride, stride),
        padding=[(padding, padding), (padding, padding)],
        dimension_numbers=("NCHW", "OIHW", "NCHW"))
    return out + bias[None, :, None, None]


if __name__ == "__main__":
    # small shapes consistent with the module
    N, Cin, H, W = 2, 4, 16, 16
    Cout, K = 8, 3
    stride, padding = 1, 1
    act_bits, w_bits = 8, 8

    key = jax.random.PRNGKey(0)
    k_x, k_w = jax.random.split(key)
    x = jax.random.uniform(k_x, (N, Cin, H, W), dtype=jnp.float32)          # activations in [0, 1)
    weight = jax.random.normal(k_w, (Cout, Cin, K, K), dtype=jnp.float32)    # torch.randn analogue
    bias = jnp.zeros((Cout,), jnp.float32)                                   # torch.zeros
    weight_scale = jnp.ones((1,), jnp.float32)                               # torch.ones(1)
    activation_scale = jnp.ones((1,), jnp.float32)                           # torch.ones(1)

    out = qat_pcilt_conv2d(x, weight, bias, weight_scale, activation_scale,
                           stride=stride, padding=padding,
                           activation_bits=act_bits, weight_bits=w_bits)
    out = jax.block_until_ready(out)

    ref = _reference(x, weight, bias, weight_scale, activation_scale,
                     stride=stride, padding=padding,
                     activation_bits=act_bits, weight_bits=w_bits)

    assert out.shape == (N, Cout, H, W), out.shape
    assert jnp.allclose(out, ref, rtol=1e-4, atol=1e-4), \
        float(jnp.max(jnp.abs(out - ref)))
    print("KERNEL_OK")
</pallas_src>

<mosaic_0001>
module attributes {stable_mosaic.version = 11 : i64} {
  func.func @_quant_weight_kernel(%arg0: i32, %arg1: memref<1xf32, #tpu.memory_space<smem>>, %arg2: memref<128x128xf32, #tpu.memory_space<vmem>>, %arg3: memref<128x128xf32, #tpu.memory_space<vmem>>) attributes {dimension_semantics = [#tpu.dimension_semantics<parallel>], iteration_bounds = array<i64: 1>, scalar_prefetch = 0 : i64, scratch_operands = 0 : i64, tpu.core_type = #tpu.core_type<tc>, window_params = [{transform_indices = @transform_0, window_bounds = array<i64: 1>}, {transform_indices = @transform_1, window_bounds = array<i64: 128, 128>}, {transform_indices = @transform_2, window_bounds = array<i64: 128, 128>}]} {
    %c0 = arith.constant 0 : index
    %0 = memref.load %arg1[%c0] : memref<1xf32, #tpu.memory_space<smem>>
    %cst = arith.constant 2.550000e+02 : f32
    %1 = arith.mulf %0, %cst : f32
    %cst_0 = arith.constant 1.000000e+00 : f32
    %2 = arith.divf %cst_0, %1 : f32
    %c0_1 = arith.constant 0 : index
    %c0_2 = arith.constant 0 : index
    %3 = vector.load %arg2[%c0_1, %c0_2] : memref<128x128xf32, #tpu.memory_space<vmem>>, vector<128x128xf32>
    %4 = vector.broadcast %1 : f32 to vector<128x128xf32>
    %5 = arith.mulf %3, %4 : vector<128x128xf32>
    %6 = math.roundeven %5 : vector<128x128xf32>
    %cst_3 = arith.constant 0.000000e+00 : f32
    %cst_4 = arith.constant 2.550000e+02 : f32
    %7 = vector.broadcast %cst_3 : f32 to vector<128x128xf32>
    %8 = arith.maximumf %7, %6 : vector<128x128xf32>
    %9 = vector.broadcast %cst_4 : f32 to vector<128x128xf32>
    %10 = arith.minimumf %9, %8 : vector<128x128xf32>
    %11 = vector.broadcast %2 : f32 to vector<128x128xf32>
    %12 = arith.mulf %10, %11 : vector<128x128xf32>
    %c0_5 = arith.constant 0 : index
    %c0_6 = arith.constant 0 : index
    %13 = vector.load %arg3[%c0_5, %c0_6] : memref<128x128xf32, #tpu.memory_space<vmem>>, vector<128x128xf32>
    tpu.vector_store %arg3[%c0_5, %c0_6], %12 {strides = array<i32>} : memref<128x128xf32, #tpu.memory_space<vmem>>, vector<128x128xf32>,
    return
  }
  func.func @transform_0(%arg0: i32) -> i32 {
    %c0_i32 = arith.constant 0 : i32
    %c0_i32_0 = arith.constant 0 : i32
    return %c0_i32 : i32
  }
  func.func @transform_1(%arg0: i32) -> (i32, i32) {
    %c0_i32 = arith.constant 0 : i32
    %c0_i32_0 = arith.constant 0 : i32
    return %c0_i32, %arg0 : i32, i32
  }
  func.func @transform_2(%arg0: i32) -> (i32, i32) {
    %c0_i32 = arith.constant 0 : i32
    %c0_i32_0 = arith.constant 0 : i32
    return %c0_i32, %arg0 : i32, i32
  }
}

</mosaic_0001>

<bundles_post_ra>
// kernel: tpu_custom_call.1
= control target key start
LH: loop header
LB: loop body
LE: loop exit
PB: predicated region body
PF: predicated region fallthrough
CT: control target
= control target key end

     0   :  { %8 = vsyncpa [#allocation4], 0  ;;  %s287_s0 = inlined_call_operand.<no memory space> [shape: f32[1], index: 0, kind: input, shape index: {}]   ;;  %s288_s1 = inlined_call_operand.hbm [shape: f32[128,128], index: 1, kind: input, shape index: {}]   ;;  %s289_s2 = inlined_call_operand.hbm [shape: f32[128,128], index: 2, kind: output, shape index: {}]  }
   0x1   :  { %9 = vsyncpa [#allocation5], 0  ;;  %s235_s9 = smov [#allocation3]   ;;  %s187_s13 = scalar_lea.hbm %s288_s1, 2048 }
   0x2   :  { %s17_s10 = sshll.u32 %s235_s9, 4  ;;  %p188_p0 = scmp.ne.s32.totalorder %s288_s1, %s187_s13  ;;  %s18_s10 = int_to_ptr.vmem [resolvable:$true] %s17_s10 }
   0x3   :  { %p191_p1 = scmp.lt.u32.totalorder %s187_s13, %s288_s1 }
   0x5   :  { %p193_p2 = pnand %p191_p1, %p188_p0 }
   0x7   :  { %196 = shalt.err (!%p193_p2)
}
   0x8   :  { %s197_s18 = scalar_lea.vmem %s18_s10, 2048  ;;  %p202_p4 = scmp.lt.s32.totalorder %s18_s10, %s18_s10 }
   0x9   :  { %p198_p3 = scmp.ne.s32.totalorder %s18_s10, %s197_s18  ;;  %p203_p5 = scmp.lt.s32.totalorder %s197_s18, %s197_s18 }
   0xb   :  { %p204_p6 = por %p203_p5, %p202_p4 }
   0xd   :  { %p205_p7 = pnand %p204_p6, %p198_p3 }
   0xf   :  { %208 = shalt.err (!%p205_p7)
}
  0x10   :  { %s236_s19 = smov 128   ;;  %s237_s20 = smov 8  }
  0x11   :  { %23 = dma.hbm_to_vmem [thread:$0]  %s288_s1, 2048, %s18_s10, [#allocation4], %s236_s19, %s236_s19, %s237_s20  }
  0x12   :  { %s28_s25 = smul.f32 255.0, %s287_s0 }
  0x13   :  { %231 = dma.done.wait [#allocation4], 2048  }
  0x14   :  { %232 = vsyncadd [#allocation4], 4294965248  ;;  %v29_v0 = vstv %s28_s25  ;;  %v32_v2 = vld [vmem:[#allocation3] sm:$0xff]  ;;  %v33_v3 = vld [vmem:[#allocation3 + $0x8] sm:$0xff]  ;;  %s238_s1 = smov [#allocation6]  }
  0x15   :  { %185 = vrcp.f32 %v29_v0  ;;  %v34_v4 = vld [vmem:[#allocation3 + $0x10] sm:$0xff]  ;;  %v35_v5 = vld [vmem:[#allocation3 + $0x18] sm:$0xff]  ;;  %v36_v6 = vld [vmem:[#allocation3 + $0x20] sm:$0xff]  ;;  %v49_v15 = vmul.f32 %v32_v2, %v29_v0  ;;  %v50_v19 = vmul.f32 %v33_v3, %v29_v0  ;;  %s151_s26 = sshll.u32 %s238_s1, 4  ;;  %s152_s26 = int_to_ptr.vmem [resolvable:$true] %s151_s26 }
  0x16   :  { %v37_v7 = vld [vmem:[#allocation3 + $0x28] sm:$0xff]  ;;  %v38_v8 = vld [vmem:[#allocation3 + $0x30] sm:$0xff]  ;;  %v39_v9 = vld [vmem:[#allocation3 + $0x38] sm:$0xff]  ;;  %v51_v20 = vmul.f32 %v34_v4, %v29_v0  ;;  %v52_v21 = vmul.f32 %v35_v5, %v29_v0  ;;  %v53_v22 = vmul.f32 %v36_v6, %v29_v0  ;;  %s209_s27 = scalar_lea.vmem %s152_s26, 2048  ;;  %p214_p9 = scmp.lt.s32.totalorder %s152_s26, %s152_s26 }
  0x17   :  { %v40_v10 = vld [vmem:[#allocation3 + $0x40] sm:$0xff]  ;;  %v41_v11 = vld [vmem:[#allocation3 + $0x48] sm:$0xff]  ;;  %v42_v12 = vld [vmem:[#allocation3 + $0x50] sm:$0xff]  ;;  %v54_v23 = vmul.f32 %v37_v7, %v29_v0  ;;  %v55_v24 = vmul.f32 %v38_v8, %v29_v0  ;;  %v56_v25 = vmul.f32 %v39_v9, %v29_v0  ;;  %v165_v34 = vround.rtne.f32 %v49_v15  ;;  %p210_p8 = scmp.ne.s32.totalorder %s152_s26, %s209_s27  ;;  %p215_p10 = scmp.lt.s32.totalorder %s209_s27, %s209_s27 }
  0x18   :  { %v43_v13 = vld [vmem:[#allocation3 + $0x58] sm:$0xff]  ;;  %v44_v14 = vld [vmem:[#allocation3 + $0x60] sm:$0xff]  ;;  %v45_v16 = vld [vmem:[#allocation3 + $0x68] sm:$0xff]  ;;  %v57_v26 = vmul.f32 %v40_v10, %v29_v0  ;;  %v58_v27 = vmul.f32 %v41_v11, %v29_v0  ;;  %v59_v28 = vmul.f32 %v42_v12, %v29_v0  ;;  %v166_v35 = vround.rtne.f32 %v50_v19 }
  0x19   :  { %v46_v17 = vld [vmem:[#allocation3 + $0x70] sm:$0xff]  ;;  %v47_v18 = vld [vmem:[#allocation3 + $0x78] sm:$0xff]  ;;  %v60_v29 = vmul.f32 %v43_v13, %v29_v0  ;;  %v61_v30 = vmul.f32 %v44_v14, %v29_v0  ;;  %v62_v31 = vmul.f32 %v45_v16, %v29_v0  ;;  %v167_v36 = vround.rtne.f32 %v51_v20  ;;  %p216_p11 = por %p215_p10, %p214_p9 }
  0x1a   :  { %v63_v32 = vmul.f32 %v46_v17, %v29_v0  ;;  %v64_v33 = vmul.f32 %v47_v18, %v29_v0  ;;  %v168_v37 = vround.rtne.f32 %v52_v21  ;;  %v169_v38 = vround.rtne.f32 %v53_v22 }
  0x1b   :  { %v170_v39 = vround.rtne.f32 %v54_v23  ;;  %v171_v40 = vround.rtne.f32 %v55_v24  ;;  %v172_v41 = vround.rtne.f32 %v56_v25  ;;  %v173_v42 = vround.rtne.f32 %v57_v26  ;;  %p217_p12 = pnand %p216_p11, %p210_p8 }
  0x1c   :  { %v174_v43 = vround.rtne.f32 %v58_v27  ;;  %v175_v44 = vround.rtne.f32 %v59_v28  ;;  %v176_v45 = vround.rtne.f32 %v60_v29  ;;  %v177_v46 = vround.rtne.f32 %v61_v30 }
  0x1d   :  { %v178_v47 = vround.rtne.f32 %v62_v31  ;;  %v179_v48 = vround.rtne.f32 %v63_v32  ;;  %v180_v49 = vround.rtne.f32 %v64_v33  ;;  %v81_v50 = vmax.f32 %v165_v34, 0.0 }
  0x1e   :  { %v82_v51 = vmax.f32 %v166_v35, 0.0  ;;  %v83_v52 = vmax.f32 %v167_v36, 0.0  ;;  %v84_v53 = vmax.f32 %v168_v37, 0.0  ;;  %v85_v54 = vmax.f32 %v169_v38, 0.0 }
  0x1f   :  { %v186_v1 = vpop.eup %185  ;;  %v86_v55 = vmax.f32 %v170_v39, 0.0  ;;  %v87_v56 = vmax.f32 %v171_v40, 0.0  ;;  %v88_v57 = vmax.f32 %v172_v41, 0.0  ;;  %v89_v58 = vmax.f32 %v173_v42, 0.0 }
  0x20   :  { %163 = vpush %v186_v1  ;;  %v90_v59 = vmax.f32 %v174_v43, 0.0  ;;  %v91_v60 = vmax.f32 %v175_v44, 0.0  ;;  %v92_v61 = vmax.f32 %v176_v45, 0.0  ;;  %v93_v62 = vmax.f32 %v177_v46, 0.0 }
  0x21   :  { %v94_v63 = vmax.f32 %v178_v47, 0.0  ;;  %v95_v0 = vmax.f32 %v179_v48, 0.0  ;;  %v96_v1 = vmax.f32 %v180_v49, 0.0  ;;  %v97_v2 = vmin.f32 %v81_v50, 255.0 }
  0x22   :  { %v98_v3 = vmin.f32 %v82_v51, 255.0  ;;  %v99_v4 = vmin.f32 %v83_v52, 255.0  ;;  %v100_v5 = vmin.f32 %v84_v53, 255.0  ;;  %v101_v6 = vmin.f32 %v85_v54, 255.0 }
  0x23   :  { %v102_v7 = vmin.f32 %v86_v55, 255.0  ;;  %v103_v8 = vmin.f32 %v87_v56, 255.0  ;;  %v104_v9 = vmin.f32 %v88_v57, 255.0  ;;  %v105_v10 = vmin.f32 %v89_v58, 255.0 }
  0x24   :  { %v106_v11 = vmin.f32 %v90_v59, 255.0  ;;  %v107_v12 = vmin.f32 %v91_v60, 255.0  ;;  %v108_v13 = vmin.f32 %v92_v61, 255.0  ;;  %v109_v14 = vmin.f32 %v93_v62, 255.0 }
  0x25   :  { %v110_v15 = vmin.f32 %v94_v63, 255.0  ;;  %v111_v16 = vmin.f32 %v95_v0, 255.0  ;;  %v112_v17 = vmin.f32 %v96_v1, 255.0 }
  0x51   :  { %s164_s0 = spop %163 }
  0x52   :  { %v113_v18 = vstv %s164_s0 }
  0x53   :  { %v114_v19 = vmul.f32 %v113_v18, %v97_v2  ;;  %v115_v20 = vmul.f32 %v113_v18, %v98_v3  ;;  %v116_v21 = vmul.f32 %v113_v18, %v99_v4  ;;  %v117_v22 = vmul.f32 %v113_v18, %v100_v5 }
  0x54   :  { %v118_v23 = vmul.f32 %v113_v18, %v101_v6  ;;  %v119_v24 = vmul.f32 %v113_v18, %v102_v7  ;;  %v120_v25 = vmul.f32 %v113_v18, %v103_v8  ;;  %v121_v26 = vmul.f32 %v113_v18, %v104_v9 }
  0x55   :  { %v122_v27 = vmul.f32 %v113_v18, %v105_v10  ;;  %v123_v28 = vmul.f32 %v113_v18, %v106_v11  ;;  %v124_v29 = vmul.f32 %v113_v18, %v107_v12  ;;  %v125_v30 = vmul.f32 %v113_v18, %v108_v13  ;;  %130 = vst [vmem:[#allocation6] sm:$0xff] %v114_v19 }
  0x56   :  { %131 = vst [vmem:[#allocation6 + $0x8] sm:$0xff] %v115_v20  ;;  %132 = vst [vmem:[#allocation6 + $0x10] sm:$0xff] %v116_v21  ;;  %v126_v31 = vmul.f32 %v113_v18, %v109_v14  ;;  %v127_v32 = vmul.f32 %v113_v18, %v110_v15  ;;  %v128_v33 = vmul.f32 %v113_v18, %v111_v16 }
  0x57   :  { %133 = vst [vmem:[#allocation6 + $0x18] sm:$0xff] %v117_v22  ;;  %v129_v34 = vmul.f32 %v113_v18, %v112_v17  ;;  %134 = vst [vmem:[#allocation6 + $0x20] sm:$0xff] %v118_v23 }
  0x58   :  { %135 = vst [vmem:[#allocation6 + $0x28] sm:$0xff] %v119_v24  ;;  %136 = vst [vmem:[#allocation6 + $0x30] sm:$0xff] %v120_v25 }
  0x59   :  { %137 = vst [vmem:[#allocation6 + $0x38] sm:$0xff] %v121_v26  ;;  %138 = vst [vmem:[#allocation6 + $0x40] sm:$0xff] %v122_v27 }
  0x5a   :  { %139 = vst [vmem:[#allocation6 + $0x48] sm:$0xff] %v123_v28  ;;  %140 = vst [vmem:[#allocation6 + $0x50] sm:$0xff] %v124_v29 }
  0x5b   :  { %141 = vst [vmem:[#allocation6 + $0x58] sm:$0xff] %v125_v30  ;;  %142 = vst [vmem:[#allocation6 + $0x60] sm:$0xff] %v126_v31 }
  0x5c   :  { %143 = vst [vmem:[#allocation6 + $0x68] sm:$0xff] %v127_v32  ;;  %144 = vst [vmem:[#allocation6 + $0x70] sm:$0xff] %v128_v33 }
  0x5d   :  { %145 = vst [vmem:[#allocation6 + $0x78] sm:$0xff] %v129_v34 }
  0x5e   :  { %220 = shalt.err (!%p217_p12)
}
  0x5f   :  { %s221_s30 = scalar_lea.hbm %s289_s2, 2048 }
  0x60   :  { %p222_p13 = scmp.ne.s32.totalorder %s289_s2, %s221_s30  ;;  %p225_p0 = scmp.lt.u32.totalorder %s221_s30, %s289_s2 }
  0x62   :  { %p227_p1 = pnand %p225_p0, %p222_p13 }
  0x64   :  { %230 = shalt.err (!%p227_p1)
}
  0x65   :  { %157 = dma.vmem_to_hbm [thread:$0]  %s152_s26, 2048, %s289_s2, [#allocation5], %s236_s19, %s236_s19, %s237_s20  }
  0x66   :  { %233 = dma.done.wait [#allocation5], 2048  }
  0x67   :  { %234 = vsyncadd [#allocation5], 4294965248 }
  0x68   :  { %161 = vsyncpa [#allocation4], 1 }
  0x69   :  { %162 = vsyncpa [#allocation5], 1 }

</bundles_post_ra>
